<compile_context>
chip_gen: v7x
topology: tpu7x:2x2x1
jax: 0.10.0
libtpu: 0.0.40
codegen_flags: <defaults>
</compile_context>

<pallas_src>
import jax
import jax.numpy as jnp
from jax.experimental import pallas as pl
from jax.experimental.pallas import tpu as pltpu


_LANE = 128                          # lane width (last-dim alignment)
_C_TILE_MAX = 1024                   # cap on output-class tile width
_WEIGHT_TILE_BYTES = 8 * 1024 * 1024 # target weight-tile size per pipeline buffer


def _round_up(x, m):
    return (x + m - 1) // m * m


def _sublane(dtype):
    # sublane-dense row padding: 8 for f32, 16 for bf16, 32 for 8-bit dtypes
    return max(8, 32 // jnp.dtype(dtype).itemsize)


def prepare_fc_params(weight, bias, weight_dtype=jnp.bfloat16):
    """One-time parameter preparation: transpose + pad + cast + block the weight.

    weight: (num_classes, F) in nn.Linear layout; bias: (num_classes,).
    """
    weight = jnp.asarray(weight)
    bias = jnp.asarray(bias)
    C, F = weight.shape

    # ---- output-class tiling ------------------------------------------------
    C_pad0 = _round_up(C, _LANE)
    c_tile = min(_C_TILE_MAX, C_pad0)
    # v7x megacore: prefer >= 2 C tiles so both TensorCores contribute HBM bandwidth.
    if C_pad0 >= 2 * _LANE and C_pad0 // c_tile < 2:
        c_tile = max(_LANE, ((C_pad0 // 2) // _LANE) * _LANE)
    C_pad = _round_up(C_pad0, c_tile)
    n_c = C_pad // c_tile

    # ---- reduction tiling (sized by a per-buffer byte budget) ----------------
    w_itemsize = jnp.dtype(weight_dtype).itemsize
    F_pad0 = _round_up(F, _LANE)
    f_tile_max = max(_LANE, (_WEIGHT_TILE_BYTES // (c_tile * w_itemsize)) // _LANE * _LANE)
    f_tile = min(f_tile_max, F_pad0)
    F_pad = _round_up(F_pad0, f_tile)

    # ---- one-time relayout: transpose, zero-pad, cast, block by output tile --
    w_t = jnp.zeros((F_pad, C_pad), dtype=weight_dtype)
    w_t = w_t.at[:F, :C].set(weight.T.astype(weight_dtype))
    # (F_pad, C_pad) -> (n_c, F_pad, c_tile): each (f_tile, c_tile) tile DMA is one
    # fully contiguous chunk (no short strided rows).
    w_blk = w_t.reshape(F_pad, n_c, c_tile).transpose(1, 0, 2)

    b_p = jnp.zeros((1, C_pad), dtype=jnp.float32)
    b_p = b_p.at[0, :C].set(bias.astype(jnp.float32))

    return dict(w=w_blk, b=b_p, C=C, F=F, F_pad=F_pad, C_pad=C_pad,
                f_tile=f_tile, c_tile=c_tile)


def fc_classification_head(x, params):
    """x: (B, S, D) -> (B, num_classes), f32. Equivalent to x.view(B, -1) @ W.T + b."""
    w_blk, b_p = params["w"], params["b"]
    C, F = params["C"], params["F"]
    F_pad, C_pad = params["F_pad"], params["C_pad"]
    f_tile, c_tile = params["f_tile"], params["c_tile"]
    n_c = C_pad // c_tile
    n_f = F_pad // f_tile

    B = x.shape[0]
    x_flat = x.reshape(B, -1)                      # == x.view(B, -1) (row-major)
    assert x_flat.shape[1] == F, "input feature size does not match prepared weight"

    # Activations follow the weight stream dtype (bf16 path -> native bf16 MXU matmul).
    act_dtype = jnp.bfloat16 if w_blk.dtype == jnp.dtype(jnp.bfloat16) else x.dtype
    B_pad = _round_up(B, _sublane(act_dtype))

    x_p = jnp.zeros((B_pad, F_pad), dtype=act_dtype)
    x_p = x_p.at[:B, :F].set(x_flat.astype(act_dtype))

    def kernel(x_ref, w_ref, b_ref, o_ref):
        # grid = (C tiles [parallel], F tiles [reduction, last/fastest axis])
        k = pl.program_id(1)

        @pl.when(k == 0)
        def _():
            o_ref[...] = jnp.zeros_like(o_ref)     # f32 output block is the accumulator

        start = pl.multiple_of(k * f_tile, f_tile)
        o_ref[...] += jnp.dot(x_ref[:, pl.ds(start, f_tile)], w_ref[0],
                              preferred_element_type=jnp.float32)

        @pl.when(k == pl.num_programs(1) - 1)
        def _():
            o_ref[...] += b_ref[...]               # bias added once, at finalize

    cost = pl.CostEstimate(
        flops=int(2 * B * F * C),
        transcendentals=0,
        bytes_accessed=int(x_p.size * x_p.dtype.itemsize      # resident: read once
                           + w_blk.size * w_blk.dtype.itemsize
                           + b_p.size * b_p.dtype.itemsize
                           + B_pad * C_pad * 4),
    )

    out_p = pl.pallas_call(
        kernel,
        out_shape=jax.ShapeDtypeStruct((B_pad, C_pad), jnp.float32),
        grid_spec=pltpu.PrefetchScalarGridSpec(
            num_scalar_prefetch=0,
            grid=(n_c, n_f),
            in_specs=[
                # Activations: single resident VMEM block (tiny), never re-streamed.
                pl.BlockSpec((B_pad, F_pad), lambda j, k: (0, 0)),
                # Weight: pre-blocked, each tile is one contiguous DMA.
                pl.BlockSpec((1, f_tile, c_tile), lambda j, k: (j, k, 0)),
                # Bias: one (1, c_tile) block per output tile.
                pl.BlockSpec((1, c_tile), lambda j, k: (0, j)),
            ],
            out_specs=pl.BlockSpec((B_pad, c_tile), lambda j, k: (0, j)),
        ),
        compiler_params=pltpu.CompilerParams(
            # C axis is independent (megacore-shardable); F is the reduction.
            dimension_semantics=("parallel", "arbitrary"),
            # Big double-buffered weight tiles overflow v5e's 16 MiB scoped default.
            vmem_limit_bytes=64 * 1024 * 1024,
        ),
        cost_estimate=cost,
    )(x_p, w_blk, b_p)

    return out_p[:B, :C]


if __name__ == "__main__":
    # Small, shape-consistent config: batch=2, seq=8, input_dim=32, classes=10
    B, S, D, C = 2, 8, 32, 10
    F = S * D

    key = jax.random.PRNGKey(0)
    kx, kw, kb = jax.random.split(key, 3)

    x = jax.random.normal(kx, (B, S, D), dtype=jnp.float32)

    # Deterministic nn.Linear-style init: U(-1/sqrt(fan_in), 1/sqrt(fan_in))
    bound = 1.0 / jnp.sqrt(jnp.float32(F))
    weight = jax.random.uniform(kw, (C, F), minval=-bound, maxval=bound,
                                dtype=jnp.float32)
    bias = jax.random.uniform(kb, (C,), minval=-bound, maxval=bound,
                              dtype=jnp.float32)

    ref = x.reshape(B, -1) @ weight.T + bias

    # Default (fast) path: bf16 weight + activation stream, f32 accumulation.
    params_bf16 = prepare_fc_params(weight, bias)            # weight_dtype=bf16
    out_bf16 = fc_classification_head(x, params_bf16)
    jax.block_until_ready(out_bf16)
    assert out_bf16.shape == (B, C)
    assert jnp.allclose(out_bf16, ref, atol=3e-2, rtol=3e-2)

    # Full-precision path: checks kernel structure (tiling / accumulation / bias).
    params_f32 = prepare_fc_params(weight, bias, weight_dtype=jnp.float32)
    out_f32 = fc_classification_head(x, params_f32)
    jax.block_until_ready(out_f32)
    assert out_f32.shape == (B, C)
    assert jnp.allclose(out_f32, ref, atol=1e-2, rtol=1e-2)

    print("KERNEL_OK")
</pallas_src>

<mosaic_0001>
module attributes {stable_mosaic.version = 11 : i64} {
  func.func @kernel(%arg0: i32, %arg1: i32, %arg2: memref<16x256xbf16, #tpu.memory_space<vmem>>, %arg3: memref<1x256x128xbf16, #tpu.memory_space<vmem>>, %arg4: memref<1x128xf32, #tpu.memory_space<vmem>>, %arg5: memref<16x128xf32, #tpu.memory_space<vmem>>) attributes {dimension_semantics = [#tpu.dimension_semantics<parallel>, #tpu.dimension_semantics<arbitrary>], iteration_bounds = array<i64: 1, 1>, scalar_prefetch = 0 : i64, scratch_operands = 0 : i64, tpu.core_type = #tpu.core_type<tc>, window_params = [{pipeline_mode = #tpu.pipeline_mode<synchronous>, transform_indices = @transform_0, window_bounds = array<i64: 16, 256>}, {transform_indices = @transform_1, window_bounds = array<i64: 1, 256, 128>}, {transform_indices = @transform_2, window_bounds = array<i64: 1, 128>}, {transform_indices = @transform_3, window_bounds = array<i64: 16, 128>}]} {
    %c0_i32 = arith.constant 0 : i32
    %0 = arith.cmpi eq, %arg1, %c0_i32 : i32
    %1 = arith.extui %0 : i1 to i32
    %c0_i32_0 = arith.constant 0 : i32
    %2 = arith.cmpi ne, %1, %c0_i32_0 : i32
    scf.if %2 {
      %cst_10 = arith.constant 0.000000e+00 : f32
      %16 = vector.broadcast %cst_10 : f32 to vector<16x128xf32>
      %c0_11 = arith.constant 0 : index
      %c0_12 = arith.constant 0 : index
      %17 = vector.load %arg5[%c0_11, %c0_12] : memref<16x128xf32, #tpu.memory_space<vmem>>, vector<16x128xf32>
      tpu.vector_store %arg5[%c0_11, %c0_12], %16 {strides = array<i32>} : memref<16x128xf32, #tpu.memory_space<vmem>>, vector<16x128xf32>,
    } else {
    }
    %c256_i32 = arith.constant 256 : i32
    %3 = arith.muli %arg1, %c256_i32 : i32
    %4 = tpu.assume_multiple %3, 256 : i32
    %c0 = arith.constant 0 : index
    %c0_1 = arith.constant 0 : index
    %5 = vector.load %arg5[%c0, %c0_1] : memref<16x128xf32, #tpu.memory_space<vmem>>, vector<16x128xf32>
    %c0_2 = arith.constant 0 : index
    %6 = arith.index_cast %4 : i32 to index
    %7 = vector.load %arg2[%c0_2, %6] : memref<16x256xbf16, #tpu.memory_space<vmem>>, vector<16x256xbf16>
    %c0_3 = arith.constant 0 : index
    %c0_4 = arith.constant 0 : index
    %c0_5 = arith.constant 0 : index
    %8 = vector.load %arg3[%c0_3, %c0_4, %c0_5] : memref<1x256x128xbf16, #tpu.memory_space<vmem>>, vector<1x256x128xbf16>
    %9 = vector.shape_cast %8 : vector<1x256x128xbf16> to vector<256x128xbf16>
    %cst = arith.constant dense<0.000000e+00> : vector<16x128xf32>
    %10 = tpu.matmul %7, %9, %cst {dimension_numbers = #tpu.dot_dimension_numbers<[1], [0], [0], [1], [0, 0, 1, 1], [], []>} : vector<16x256xbf16>, vector<256x128xbf16>, vector<16x128xf32> -> vector<16x128xf32>
    %11 = arith.addf %5, %10 : vector<16x128xf32>
    %c0_6 = arith.constant 0 : index
    %c0_7 = arith.constant 0 : index
    %12 = vector.load %arg5[%c0_6, %c0_7] : memref<16x128xf32, #tpu.memory_space<vmem>>, vector<16x128xf32>
    tpu.vector_store %arg5[%c0_6, %c0_7], %11 {strides = array<i32>} : memref<16x128xf32, #tpu.memory_space<vmem>>, vector<16x128xf32>,
    %c0_i32_8 = arith.constant 0 : i32
    %13 = arith.cmpi eq, %arg1, %c0_i32_8 : i32
    %14 = arith.extui %13 : i1 to i32
    %c0_i32_9 = arith.constant 0 : i32
    %15 = arith.cmpi ne, %14, %c0_i32_9 : i32
    scf.if %15 {
      %c0_10 = arith.constant 0 : index
      %c0_11 = arith.constant 0 : index
      %16 = vector.load %arg5[%c0_10, %c0_11] : memref<16x128xf32, #tpu.memory_space<vmem>>, vector<16x128xf32>
      %c0_12 = arith.constant 0 : index
      %c0_13 = arith.constant 0 : index
      %17 = vector.load %arg4[%c0_12, %c0_13] : memref<1x128xf32, #tpu.memory_space<vmem>>, vector<1x128xf32>
      %18 = vector.broadcast %17 : vector<1x128xf32> to vector<16x128xf32>
      %19 = arith.addf %16, %18 : vector<16x128xf32>
      %c0_14 = arith.constant 0 : index
      %c0_15 = arith.constant 0 : index
      %20 = vector.load %arg5[%c0_14, %c0_15] : memref<16x128xf32, #tpu.memory_space<vmem>>, vector<16x128xf32>
      tpu.vector_store %arg5[%c0_14, %c0_15], %19 {strides = array<i32>} : memref<16x128xf32, #tpu.memory_space<vmem>>, vector<16x128xf32>,
    } else {
    }
    return
  }
  func.func @transform_0(%arg0: i32, %arg1: i32) -> (i32, i32) {
    %c0_i32 = arith.constant 0 : i32
    %c0_i32_0 = arith.constant 0 : i32
    %c0_i32_1 = arith.constant 0 : i32
    return %c0_i32, %c0_i32_0 : i32, i32
  }
  func.func @transform_1(%arg0: i32, %arg1: i32) -> (i32, i32, i32) {
    %c0_i32 = arith.constant 0 : i32
    %c0_i32_0 = arith.constant 0 : i32
    return %arg0, %arg1, %c0_i32 : i32, i32, i32
  }
  func.func @transform_2(%arg0: i32, %arg1: i32) -> (i32, i32) {
    %c0_i32 = arith.constant 0 : i32
    %c0_i32_0 = arith.constant 0 : i32
    return %c0_i32, %arg0 : i32, i32
  }
  func.func @transform_3(%arg0: i32, %arg1: i32) -> (i32, i32) {
    %c0_i32 = arith.constant 0 : i32
    %c0_i32_0 = arith.constant 0 : i32
    return %c0_i32, %arg0 : i32, i32
  }
}

</mosaic_0001>

<bundles_post_ra>
// kernel: tpu_custom_call.1
= control target key start
LH: loop header
LB: loop body
LE: loop exit
PB: predicated region body
PF: predicated region fallthrough
CT: control target
= control target key end

     0   :  { %8 = vsyncpa [#allocation3], 0  ;;  %s534_s0 = inlined_call_operand.hbm [shape: bf16[16,256], index: 0, kind: input, shape index: {}]   ;;  %s535_s1 = inlined_call_operand.hbm [shape: bf16[1,256,128], index: 1, kind: input, shape index: {}]   ;;  %s536_s2 = inlined_call_operand.hbm [shape: f32[1,128], index: 2, kind: input, shape index: {}]   ;;  %s537_s3 = inlined_call_operand.hbm [shape: f32[16,128], index: 3, kind: output, shape index: {}]  }
   0x1   :  { %9 = vsyncpa [#allocation6], 0 }
   0x2   :  { %10 = vsyncpa [#allocation4], 0  ;;  %s452_s12 = smov [#allocation5]   ;;  %s358_s16 = scalar_lea.hbm %s535_s1, 2048 }
   0x3   :  { %s28_s13 = sshll.u32 %s452_s12, 4  ;;  %p359_p0 = scmp.ne.s32.totalorder %s535_s1, %s358_s16  ;;  %s29_s13 = int_to_ptr.vmem [resolvable:$true] %s28_s13 }
   0x4   :  { %p362_p1 = scmp.lt.u32.totalorder %s358_s16, %s535_s1 }
   0x6   :  { %p364_p2 = pnand %p362_p1, %p359_p0 }
   0x8   :  { %367 = shalt.err (!%p364_p2)
}
   0x9   :  { %s368_s21 = scalar_lea.vmem %s29_s13, 2048  ;;  %p373_p4 = scmp.lt.s32.totalorder %s29_s13, %s29_s13 }
   0xa   :  { %p369_p3 = scmp.ne.s32.totalorder %s29_s13, %s368_s21  ;;  %p374_p5 = scmp.lt.s32.totalorder %s368_s21, %s368_s21 }
   0xc   :  { %p375_p6 = por %p374_p5, %p373_p4 }
   0xe   :  { %p376_p7 = pnand %p375_p6, %p369_p3 }
  0x10   :  { %379 = shalt.err (!%p376_p7)
}
  0x11   :  { %s453_s22 = smov 64   ;;  %s454_s23 = smov 4  }
  0x12   :  { %34 = dma.hbm_to_vmem [thread:$0]  %s535_s1, 2048, %s29_s13, [#allocation6], %s453_s22, %s453_s22, %s454_s23  }
  0x13   :  { %s455_s26 = smov [#allocation2]   ;;  %s380_s30 = scalar_lea.hbm %s534_s0, 256 }
  0x14   :  { %s16_s27 = sshll.u32 %s455_s26, 4  ;;  %p381_p8 = scmp.ne.s32.totalorder %s534_s0, %s380_s30  ;;  %s17_s27 = int_to_ptr.vmem [resolvable:$true] %s16_s27 }
  0x15   :  { %p384_p9 = scmp.lt.u32.totalorder %s380_s30, %s534_s0 }
  0x17   :  { %p386_p10 = pnand %p384_p9, %p381_p8 }
  0x19   :  { %389 = shalt.err (!%p386_p10)
}
  0x1a   :  { %s390_s8 = scalar_lea.vmem %s17_s27, 256  ;;  %p395_p12 = scmp.lt.s32.totalorder %s17_s27, %s17_s27 }
  0x1b   :  { %p391_p11 = scmp.ne.s32.totalorder %s17_s27, %s390_s8  ;;  %p396_p13 = scmp.lt.s32.totalorder %s390_s8, %s390_s8 }
  0x1d   :  { %p397_p0 = por %p396_p13, %p395_p12 }
  0x1f   :  { %p398_p1 = pnand %p397_p0, %p391_p11 }
  0x21   :  { %401 = shalt.err (!%p398_p1)
}
  0x22   :  { %s456_s1 = smov 128   ;;  %s457_s9 = smov 8  }
  0x23   :  { %22 = dma.hbm_to_vmem [thread:$0]  %s534_s0, 256, %s17_s27, [#allocation3], %s456_s1, %s456_s1, %s457_s9  }
  0x24   :  { %s458_s12 = smov [#allocation7]   ;;  %s402_s16 = scalar_lea.hbm %s536_s2, 16 }
  0x25   :  { %s41_s13 = sshll.u32 %s458_s12, 4  ;;  %p403_p2 = scmp.ne.s32.totalorder %s536_s2, %s402_s16  ;;  %s42_s13 = int_to_ptr.vmem [resolvable:$true] %s41_s13 }
  0x26   :  { %p406_p3 = scmp.lt.u32.totalorder %s402_s16, %s536_s2 }
  0x28   :  { %p408_p4 = pnand %p406_p3, %p403_p2 }
  0x2a   :  { %411 = shalt.err (!%p408_p4)
}
  0x2b   :  { %s412_s21 = scalar_lea.vmem %s42_s13, 16  ;;  %s416_s0 = scalar_lea.vmem %s42_s13, 32 }
  0x2c   :  { %p413_p5 = scmp.ne.s32.totalorder %s42_s13, %s412_s21  ;;  %p417_p6 = scmp.lt.s32.totalorder %s42_s13, %s42_s13 }
  0x2d   :  { %p418_p7 = scmp.lt.s32.totalorder %s416_s0, %s412_s21 }
  0x2f   :  { %p419_p8 = por %p418_p7, %p417_p6 }
  0x31   :  { %p420_p9 = pnand %p419_p8, %p413_p5 }
  0x33   :  { %423 = shalt.err (!%p420_p9)
}
  0x34   :  { %44 = dma.hbm_to_vmem [thread:$0]  %s536_s2, 16, %s42_s13, [#allocation6]  }
  0x35   :  { %446 = dma.done.wait [#allocation3], 256  }
  0x36   :  { %447 = vsyncadd [#allocation3], 4294967040 }
  0x37   :  { %448 = dma.done.wait [#allocation6], 2064  }
  0x38   :  { %449 = vsyncadd [#allocation6], 4294965232  ;;  %v339_v0 = vld [vmem:[#allocation5 + $0x40] sm:$0xff]   ;;  %v341_v2 = vld [vmem:[#allocation5 + $0x48] sm:$0xff]   ;;  %s459_s2 = smov [#allocation8]  }
  0x39   :  { %v340_v1 = vld [vmem:[#allocation5] sm:$0xff]   ;;  %308 = vmatprep.subr.bf16.mxu0 %v339_v0  ;;  %v342_v3 = vld [vmem:[#allocation5 + $0x8] sm:$0xff]   ;;  %v343_v4 = vld [vmem:[#allocation5 + $0x50] sm:$0xff]   ;;  %s274_s24 = sshll.u32 %s459_s2, 4  ;;  %s275_s24 = int_to_ptr.vmem [resolvable:$true] %s274_s24 }
  0x3a   :  { %309 = vmatpush3.bf16.msra.mxu0 %v340_v1  ;;  %v344_v5 = vld [vmem:[#allocation5 + $0x10] sm:$0xff]   ;;  %v345_v6 = vld [vmem:[#allocation5 + $0x58] sm:$0xff]   ;;  %v347_v8 = vld [vmem:[#allocation5 + $0x60] sm:$0xff]   ;;  %s424_s25 = scalar_lea.vmem %s275_s24, 256  ;;  %p429_p11 = scmp.lt.s32.totalorder %s275_s24, %s275_s24 }
  0x3b   :  { %310 = vmatprep.subr.bf16.mxu0 %v341_v2  ;;  %v346_v7 = vld [vmem:[#allocation5 + $0x18] sm:$0xff]   ;;  %v348_v9 = vld [vmem:[#allocation5 + $0x20] sm:$0xff]   ;;  %v349_v10 = vld [vmem:[#allocation5 + $0x68] sm:$0xff]   ;;  %p425_p10 = scmp.ne.s32.totalorder %s275_s24, %s424_s25  ;;  %p430_p12 = scmp.lt.s32.totalorder %s424_s25, %s424_s25 }
  0x3c   :  { %v357_v11 = vld [vmem:[#allocation2 + $0x4] ss:$8 sps:$4 sm:$0xff]   ;;  %v350_v12 = vld [vmem:[#allocation5 + $0x28] sm:$0xff]   ;;  %v355_v17 = vld [vmem:[#allocation2] ss:$8 sps:$4 sm:$0xff]  }
  0x3d   :  { %240 = vmatprep.mubr.bf16.mxu0 %v357_v11  ;;  %v351_v13 = vld [vmem:[#allocation5 + $0x70] sm:$0xff]   ;;  %v353_v15 = vld [vmem:[#allocation5 + $0x78] sm:$0xff]   ;;  %v307_v23 = vld [vmem:[#allocation7] ss:$0 sm:$0xff]  ;;  %p431_p13 = por %p430_p12, %p429_p11 }
  0x3e   :  { %311 = vmatpush3.bf16.msra.mxu0 %v342_v3  ;;  %v352_v14 = vld [vmem:[#allocation5 + $0x30] sm:$0xff]   ;;  %v354_v16 = vld [vmem:[#allocation5 + $0x38] sm:$0xff]  }
  0x3f   :  { %312 = vmatprep.subr.bf16.mxu0 %v343_v4  ;;  %p432_p0 = pnand %p431_p13, %p425_p10 }
  0x42   :  { %313 = vmatpush3.bf16.msra.mxu0 %v344_v5 }
  0x43   :  { %314 = vmatprep.subr.bf16.mxu0 %v345_v6 }
  0x46   :  { %315 = vmatpush3.bf16.msra.mxu0 %v346_v7 }
  0x47   :  { %316 = vmatprep.subr.bf16.mxu0 %v347_v8 }
  0x4a   :  { %317 = vmatpush3.bf16.msra.mxu0 %v348_v9 }
  0x4b   :  { %318 = vmatprep.subr.bf16.mxu0 %v349_v10 }
  0x4e   :  { %319 = vmatpush3.bf16.msra.mxu0 %v350_v12 }
  0x4f   :  { %320 = vmatprep.subr.bf16.mxu0 %v351_v13 }
  0x52   :  { %321 = vmatpush3.bf16.msra.mxu0 %v352_v14 }
  0x53   :  { %322 = vmatprep.subr.bf16.mxu0 %v353_v15 }
  0x56   :  { %323 = vmatpush3.bf16.msra.mxu0 %v354_v16 }
  0x59   :  { %241 = vmatmul.mubr.bf16.vlgmr.msra.gmra.mrb[0].mxu0 %v355_v17 }
 0x12c   :  { %v324_v18 = vpop.f32.mrb[0].mxu0 }
 0x12d   :  { %v325_v19 = vpop.f32.mrb[1].mxu0 }
 0x12e   :  { %v326_v20 = vadd.f32 %v325_v19, %v324_v18  ;;  %v327_v21 = vpop.f32.mrb[2].mxu0 }
 0x12f   :  { %v328_v22 = vpop.f32.mrb[3].mxu0 }
 0x130   :  { %v329_v24 = vadd.f32 %v328_v22, %v327_v21  ;;  %v265_v25 = vadd.f32 %v326_v20, %v307_v23 }
 0x132   :  { %v266_v26 = vadd.f32 %v329_v24, %v307_v23  ;;  %267 = vst [vmem:[#allocation8] sm:$0xff] %v265_v25 }
 0x134   :  { %268 = vst [vmem:[#allocation8 + $0x8] sm:$0xff] %v266_v26 }
 0x135   :  { %435 = shalt.err (!%p432_p0)
}
 0x136   :  { %s436_s28 = scalar_lea.hbm %s537_s3, 256 }
 0x137   :  { %p437_p1 = scmp.ne.s32.totalorder %s537_s3, %s436_s28  ;;  %p440_p2 = scmp.lt.u32.totalorder %s436_s28, %s537_s3 }
 0x139   :  { %p442_p3 = pnand %p440_p2, %p437_p1 }
 0x13b   :  { %445 = shalt.err (!%p442_p3)
}
 0x13c   :  { %280 = dma.vmem_to_hbm [thread:$0]  %s275_s24, 256, %s537_s3, [#allocation4], %s456_s1, %s456_s1, %s457_s9  }
 0x13d   :  { %450 = dma.done.wait [#allocation4], 256  }
 0x13e   :  { %451 = vsyncadd [#allocation4], 4294967040 }
 0x13f   :  { %284 = vsyncpa [#allocation3], 1 }
 0x140   :  { %285 = vsyncpa [#allocation6], 1 }
 0x141   :  { %286 = vsyncpa [#allocation4], 1 }

</bundles_post_ra>
